<compile_context>
chip_gen: v5e
topology: v5e:2x2
jax: 0.10.0
libtpu: 0.0.40
codegen_flags: <defaults>
</compile_context>

<pallas_src>
import functools

import jax
import jax.numpy as jnp
from jax.experimental import pallas as pl
from jax.experimental.pallas import tpu as pltpu


def _round_up(a, b):
    return ((a + b - 1) // b) * b


def _padded_outputs(n_outputs):
    # Lane-dense (full vst) output only pays off once the width is at least a
    # full 128-lane vreg; for small n_outputs keep it unpadded (full-extent
    # block -> masked stores but far less write traffic and no slice pass).
    if n_outputs >= 128:
        return _round_up(n_outputs, 128)
    return n_outputs


def _vmem_bytes(block_rows, n_inputs, n_out_p):
    w = n_inputs * n_out_p * 2            # resident bf16 weight (single buffer)
    x = 2 * block_rows * n_inputs * 4     # double-buffered f32 x tiles
    o = 2 * block_rows * n_out_p * 4      # double-buffered f32 out tiles
    tmp = 3 * block_rows * n_out_p * 4    # logits / exp / misc f32 temporaries
    b = n_out_p * 4
    return w + x + o + tmp + b


def _choose_block_rows(batch, n_inputs, n_out_p):
    if batch <= 256:
        # Single block; x/out tiles are f32 in VMEM -> 8-row sublane alignment.
        block_rows = _round_up(batch, 8)
    elif batch <= 1024:
        # Guarantee >= 2 grid steps so v7x's two TensorCores both get a block.
        block_rows = _round_up(-(-batch // 2), 16)
    else:
        block_rows = 512
    # Generation-aware guard (v7x has only 64 MiB VMEM per TC): shrink blocks
    # until the resident-W + pipelined tiles + temporaries fit comfortably.
    while block_rows > 16 and _vmem_bytes(block_rows, n_inputs, n_out_p) > (40 << 20):
        block_rows = max(16, _round_up(block_rows // 2, 8))
    return block_rows


def _linear_softmax_kernel(x_ref, w_ref, b_ref, o_ref):
    # x_ref: (block_rows, n_inputs)   f32   (cast to bf16 here; VPU hides under MXU)
    # w_ref: (n_inputs, n_out_p)      bf16  (K-major, pre-transposed; resident)
    # b_ref: (1, n_out_p)             f32   (padded entries = -1e30 -> exp -> 0)
    # o_ref: (block_rows, n_out_p)    f32
    x_bf16 = x_ref[...].astype(jnp.bfloat16)
    logits = jnp.dot(x_bf16, w_ref[...],
                     preferred_element_type=jnp.float32) + b_ref[...]

    # Numerically-stable softmax over the last axis (== PyTorch dim=1).
    m = jnp.max(logits, axis=-1, keepdims=True)
    e = jnp.exp(logits - m)               # padded cols: exp(-1e30 - m) == 0
    denom = jnp.sum(e, axis=-1, keepdims=True)
    # Exact normalization so rows sum to 1 (approx reciprocal violated that).
    o_ref[...] = (e / denom).astype(o_ref.dtype)


def prepare_params(weight, bias):
    """One-time param prep (pad / transpose / cast) — hoist out of the hot path.

    Args:
      weight: (n_outputs, n_inputs) f32 — PyTorch nn.Linear layout.
      bias:   (n_outputs,) f32
    Returns:
      w_t: (n_inputs, n_out_p) bf16, K-major (already transposed for the MXU).
      b_p: (1, n_out_p) f32 with padded entries set to -1e30 (softmax mask).
    """
    n_outputs, _ = weight.shape
    n_out_p = _padded_outputs(n_outputs)
    pad = n_out_p - n_outputs
    w_t = jnp.pad(weight, ((0, pad), (0, 0))).T.astype(jnp.bfloat16)
    b_p = jnp.pad(bias.astype(jnp.float32), (0, pad),
                  constant_values=-1e30).reshape(1, n_out_p)
    return w_t, b_p


@functools.partial(jax.jit, static_argnames=("n_outputs",))
def forward_prepared(x, w_t, b_p, *, n_outputs):
    """softmax(x @ W.T + b, axis=1) given pre-prepared (padded/transposed) params."""
    batch, n_inputs = x.shape
    n_out_p = w_t.shape[1]

    block_rows = _choose_block_rows(batch, n_inputs, n_out_p)
    grid = (pl.cdiv(batch, block_rows),)

    cost = pl.CostEstimate(
        flops=2 * batch * n_inputs * n_out_p,
        transcendentals=batch * n_out_p,
        bytes_accessed=(batch * n_inputs * 4 + n_inputs * n_out_p * 2
                        + n_out_p * 4 + batch * n_out_p * 4),
    )
    vmem_limit = min(
        int(1.5 * _vmem_bytes(block_rows, n_inputs, n_out_p)) + (4 << 20),
        48 << 20,   # leave headroom even on v7x's 64 MiB/TC VMEM
    )

    # TODO(synk): if the resident bf16 weight ever exceeds ~16-24 MiB (v7x-safe
    # threshold), add an N-tiling grid axis with running-max/sum (online
    # softmax) scratch instead of keeping the whole weight in VMEM.
    out = pl.pallas_call(
        _linear_softmax_kernel,
        out_shape=jax.ShapeDtypeStruct((batch, n_out_p), jnp.float32),
        grid_spec=pltpu.PrefetchScalarGridSpec(
            num_scalar_prefetch=0,
            grid=grid,
            in_specs=[
                pl.BlockSpec((block_rows, n_inputs), lambda i: (i, 0)),
                pl.BlockSpec((n_inputs, n_out_p), lambda i: (0, 0)),  # resident W^T
                pl.BlockSpec((1, n_out_p), lambda i: (0, 0)),         # resident bias
            ],
            out_specs=pl.BlockSpec((block_rows, n_out_p), lambda i: (i, 0)),
        ),
        compiler_params=pltpu.CompilerParams(
            dimension_semantics=("parallel",),   # megacore: split row blocks
            vmem_limit_bytes=vmem_limit,
        ),
        cost_estimate=cost,
    )(x, w_t, b_p)

    if n_out_p != n_outputs:
        out = out[:, :n_outputs]   # only when padding to 128 lanes was applied
    return out


def ccg_dlnn_outputs_forward(x, weight, bias):
    """Convenience one-shot API (prep + forward). For repeated inference call
    prepare_params() once and reuse forward_prepared()."""
    w_t, b_p = prepare_params(weight, bias)
    return forward_prepared(x, w_t, b_p, n_outputs=weight.shape[0])


def init_params(key, n_inputs, n_outputs, weight_multiplier=0.01):
    """Deterministic init matching nn.init.uniform_(-wm, wm) on weight & bias."""
    kw, kb = jax.random.split(key)
    weight = jax.random.uniform(
        kw, (n_outputs, n_inputs), jnp.float32,
        minval=-weight_multiplier, maxval=weight_multiplier)
    bias = jax.random.uniform(
        kb, (n_outputs,), jnp.float32,
        minval=-weight_multiplier, maxval=weight_multiplier)
    return weight, bias


if __name__ == "__main__":
    key = jax.random.PRNGKey(0)
    k_x, k_p = jax.random.split(key)

    batch = 8
    n_inputs = 32
    n_outputs = 16

    x = jax.random.normal(k_x, (batch, n_inputs), jnp.float32)
    weight, bias = init_params(k_p, n_inputs, n_outputs)

    # One-time param prep hoisted out of the hot loop (perf feedback).
    w_t, b_p = prepare_params(weight, bias)
    out = forward_prepared(x, w_t, b_p, n_outputs=n_outputs)
    out = jax.block_until_ready(out)

    # Sanity check against a pure-JAX f32 reference (bf16 matmul => slightly
    # looser value tolerance; rows must sum to 1 with exact normalization).
    ref = jax.nn.softmax(x @ weight.T + bias, axis=1)
    assert out.shape == (batch, n_outputs)
    assert jnp.allclose(out, ref, atol=5e-3, rtol=5e-2)
    assert jnp.allclose(jnp.sum(out, axis=1), jnp.ones((batch,)), atol=1e-3)

    print("KERNEL_OK")
</pallas_src>

<mosaic_0001>
module attributes {stable_mosaic.version = 11 : i64} {
  func.func @_linear_softmax_kernel(%arg0: i32, %arg1: memref<8x32xf32, #tpu.memory_space<vmem>>, %arg2: memref<32x16xbf16, #tpu.memory_space<vmem>>, %arg3: memref<1x16xf32, #tpu.memory_space<vmem>>, %arg4: memref<8x16xf32, #tpu.memory_space<vmem>>) attributes {dimension_semantics = [#tpu.dimension_semantics<parallel>], iteration_bounds = array<i64: 1>, scalar_prefetch = 0 : i64, scratch_operands = 0 : i64, tpu.core_type = #tpu.core_type<tc>, window_params = [{transform_indices = @transform_0, window_bounds = array<i64: 8, 32>}, {pipeline_mode = #tpu.pipeline_mode<synchronous>, transform_indices = @transform_1, window_bounds = array<i64: 32, 16>}, {pipeline_mode = #tpu.pipeline_mode<synchronous>, transform_indices = @transform_2, window_bounds = array<i64: 1, 16>}, {transform_indices = @transform_3, window_bounds = array<i64: 8, 16>}]} {
    %c0 = arith.constant 0 : index
    %c0_0 = arith.constant 0 : index
    %0 = vector.load %arg1[%c0, %c0_0] : memref<8x32xf32, #tpu.memory_space<vmem>>, vector<8x32xf32>
    %1 = arith.truncf %0 : vector<8x32xf32> to vector<8x32xbf16>
    %c0_1 = arith.constant 0 : index
    %c0_2 = arith.constant 0 : index
    %2 = vector.load %arg2[%c0_1, %c0_2] : memref<32x16xbf16, #tpu.memory_space<vmem>>, vector<32x16xbf16>
    %cst = arith.constant dense<0.000000e+00> : vector<8x16xf32>
    %3 = tpu.matmul %1, %2, %cst {dimension_numbers = #tpu.dot_dimension_numbers<[1], [0], [0], [1], [0, 0, 1, 1], [], []>} : vector<8x32xbf16>, vector<32x16xbf16>, vector<8x16xf32> -> vector<8x16xf32>
    %c0_3 = arith.constant 0 : index
    %c0_4 = arith.constant 0 : index
    %4 = vector.load %arg3[%c0_3, %c0_4] : memref<1x16xf32, #tpu.memory_space<vmem>>, vector<1x16xf32>
    %5 = vector.broadcast %4 : vector<1x16xf32> to vector<8x16xf32>
    %6 = arith.addf %3, %5 : vector<8x16xf32>
    %cst_5 = arith.constant dense<0xFF800000> : vector<8xf32>
    %7 = vector.multi_reduction <maximumf>, %6, %cst_5 [1] : vector<8x16xf32> to vector<8xf32>
    %8 = vector.shape_cast %7 : vector<8xf32> to vector<8x1xf32>
    %9 = vector.broadcast %8 : vector<8x1xf32> to vector<8x16xf32>
    %10 = arith.subf %6, %9 : vector<8x16xf32>
    %11 = math.exp %10 : vector<8x16xf32>
    %cst_6 = arith.constant dense<0.000000e+00> : vector<8xf32>
    %12 = vector.multi_reduction <add>, %11, %cst_6 [1] : vector<8x16xf32> to vector<8xf32>
    %13 = vector.shape_cast %12 : vector<8xf32> to vector<8x1xf32>
    %14 = vector.broadcast %13 : vector<8x1xf32> to vector<8x16xf32>
    %15 = arith.divf %11, %14 : vector<8x16xf32>
    %c0_7 = arith.constant 0 : index
    %c0_8 = arith.constant 0 : index
    %16 = vector.load %arg4[%c0_7, %c0_8] : memref<8x16xf32, #tpu.memory_space<vmem>>, vector<8x16xf32>
    tpu.vector_store %arg4[%c0_7, %c0_8], %15 {strides = array<i32>} : memref<8x16xf32, #tpu.memory_space<vmem>>, vector<8x16xf32>,
    return
  }
  func.func @transform_0(%arg0: i32) -> (i32, i32) {
    %c0_i32 = arith.constant 0 : i32
    %c0_i32_0 = arith.constant 0 : i32
    return %arg0, %c0_i32 : i32, i32
  }
  func.func @transform_1(%arg0: i32) -> (i32, i32) {
    %c0_i32 = arith.constant 0 : i32
    %c0_i32_0 = arith.constant 0 : i32
    %c0_i32_1 = arith.constant 0 : i32
    return %c0_i32, %c0_i32_0 : i32, i32
  }
  func.func @transform_2(%arg0: i32) -> (i32, i32) {
    %c0_i32 = arith.constant 0 : i32
    %c0_i32_0 = arith.constant 0 : i32
    %c0_i32_1 = arith.constant 0 : i32
    return %c0_i32, %c0_i32_0 : i32, i32
  }
  func.func @transform_3(%arg0: i32) -> (i32, i32) {
    %c0_i32 = arith.constant 0 : i32
    %c0_i32_0 = arith.constant 0 : i32
    return %arg0, %c0_i32 : i32, i32
  }
}

</mosaic_0001>

<bundles_post_ra>
// kernel: forward_prepared.1
= control target key start
LH: loop header
LB: loop body
LE: loop exit
PB: predicated region body
PF: predicated region fallthrough
CT: control target
= control target key end

     0   :  { %s179_s0 = inlined_call_operand.vmem [shape: f32[8,32], index: 0, kind: input, shape index: {}]   ;;  %s180_s1 = inlined_call_operand.vmem [shape: bf16[32,16], index: 1, kind: input, shape index: {}]   ;;  %s181_s2 = inlined_call_operand.vmem [shape: f32[1,16], index: 2, kind: input, shape index: {}]   ;;  %s182_s3 = inlined_call_operand.hbm [shape: f32[8,16], index: 3, kind: output, shape index: {}]  }
   0x1   :  { %v107_v0 = vld [vmem:[%s180_s1 + $0x8] sm:$0xff] }
   0x2   :  { %8 = vsyncpa [#allocation3], 0  ;;  %48 = vmatpush.bf16.msra.mxu0 %v107_v0  ;;  %v106_v1 = vld [vmem:[%s180_s1] sm:$0xff]  ;;  %vm38_vm0 = vcmask 261120   ;;  %vm55_vm1 = vcmask 130048   ;;  %s88_s21 = sshll.u32 %s182_s3, 4  ;;  %s89_s21 = int_to_ptr.hbm [resolvable:$true] %s88_s21 }
   0x3   :  { %v16_v2 = vld [vmem:[%s179_s0] sm:$0xff]  ;;  %s140_s0 = smov [#allocation2]  }
   0x4   :  { %v17_v3 = vpack.c.bf16 %v16_v2, %v16_v2  ;;  %v109_v4 = vld [vmem:[%s181_s2] ss:$0 sm:$0xff]  ;;  %s86_s1 = sshll.u32 %s140_s0, 4  ;;  %s87_s1 = int_to_ptr.vmem [resolvable:$true] %s86_s1 }
   0x6   :  { %49 = vmatpush.bf16.msra.mxu0 %v106_v1 }
   0x9   :  { %105 = vmatmul.msk.bf16.vlgmr.msra.gmra.mxu0 %vm38_vm0, %v17_v3 }
  0x86   :  { %v51_v5 = vpop.f32.mrf.mxu0 }
  0x87   :  { %v52_v6 = vadd.f32 %v109_v4, %v51_v5 }
  0x89   :  { %v56_v7 = vsel %vm55_vm1, %v52_v6, -inf }
  0x8a   :  { %57 = vmax.xlane.f32.xlu0 %v56_v7 }
  0x8e   :  { %v53_v8 = vpop.f32.mrf.mxu0 }
  0xfd   :  { %v58_v9 = vpop.xlane.xlu0 %57 }
  0xfe   :  { %v59_v10 = vsub.f32 %v52_v6, %v58_v9 }
 0x100   :  { %v60_v11 = vmul.f32 1.442695, %v59_v10 }
 0x102   :  { %110 = vpow2.f32 %v60_v11 }
 0x108   :  { %v111_v12 = vpop.eup %110 }
 0x109   :  { %v62_v13 = vsel %vm55_vm1, %v111_v12, 0.0 }
 0x10a   :  { %63 = vadd.xlane.f32.xlu0 %v62_v13 }
 0x17d   :  { %v64_v14 = vpop.xlane.xlu0 %63 }
 0x17e   :  { %112 = vrcp.f32 %v64_v14  ;;  %v76_v18 = vand.u32 2147483648, %v64_v14  ;;  %v74_v20 = vand.u32 2147483647, %v64_v14  ;;  %vm70_vm3 = vweird.f32 %v64_v14 }
 0x180   :  { %v77_v22 = vor.u32 1.1754944e-38, %v76_v18  ;;  %vm75_vm5 = vcmp.eq.f32.partialorder %v74_v20, 8.507059e+37 }
 0x184   :  { %v113_v15 = vpop.eup %112 }
 0x185   :  { %v66_v16 = vmul.f32 %v113_v15, %v64_v14  ;;  %vm71_vm2 = vweird.f32 %v113_v15 }
 0x186   :  { %vm72_vm4 = vmor %vm70_vm3, %vm71_vm2 }
 0x187   :  { %v67_v17 = vsub.f32 1.0, %v66_v16 }
 0x189   :  { %v68_v19 = vmul.f32 %v113_v15, %v67_v17 }
 0x18b   :  { %v69_v21 = vadd.f32 %v113_v15, %v68_v19 }
 0x18d   :  { %v73_v23 = vsel %vm72_vm4, %v113_v15, %v69_v21 }
 0x18e   :  { %v78_v24 = vsel %vm75_vm5, %v77_v22, %v73_v23 }
 0x18f   :  { %v79_v25 = vmul.f32 %v111_v12, %v78_v24 }
 0x191   :  { %80 = vst.msk [vmem:[#allocation2] sm:$0xff] %vm55_vm1, %v79_v25 }
 0x192   :  { %91 = dma.vmem_to_hbm [thread:$0]  %s87_s1, 128, %s89_s21, [#allocation3]  }
 0x193   :  { %138 = dma.done.wait [#allocation3], 128  }
 0x194   :  { %139 = vsyncadd [#allocation3], 4294967168 }
 0x195   :  { %96 = vsyncpa [#allocation3], 1 }

</bundles_post_ra>
